<compile_context>
chip_gen: v6e
topology: v6e:2x2x1
jax: 0.10.0
libtpu: 0.0.40
codegen_flags: <defaults>
</compile_context>

<pallas_src>
import jax
import jax.numpy as jnp
from jax.experimental import pallas as pl
from jax.experimental.pallas import tpu as pltpu


def _attn_kernel(enc_ref, dec_proj_ref, w1e_ref, w2_ref, out_ref):
    # enc_ref      : (TB, S, H_enc)          encoder states (f32 or bf16)
    # dec_proj_ref : (TB, 1, latent)   f32   dec_flat @ W1_dec + b1 (precomputed)
    # w1e_ref      : (H_enc, latent)         encoder column-block of W1
    # w2_ref       : (1, 1, latent)    f32   linear_2 weight (row vector)
    # out_ref      : (TB, 1, H_enc)          context
    enc = enc_ref[...]
    tb, s, h_enc = enc.shape
    latent = w1e_ref.shape[1]

    # linear_1 (encoder part) on the MXU with f32 accumulation; add the
    # precomputed decoder projection (which already folds in b1), then tanh.
    h2d = jnp.dot(enc.reshape(tb * s, h_enc), w1e_ref[...],
                  preferred_element_type=jnp.float32)                 # (TB*S, L)
    h = jnp.tanh(h2d.reshape(tb, s, latent) + dec_proj_ref[...])      # (TB, S, L)

    # linear_2 -> lane-major scores (TB, S); softmax over the lane (seq) axis.
    scores = jnp.sum(h * w2_ref[...], axis=-1)                        # (TB, S)
    m = jnp.max(scores, axis=-1, keepdims=True)                       # (TB, 1)
    e = jnp.exp(scores - m)
    attn = e * pl.reciprocal(jnp.sum(e, axis=-1, keepdims=True), approx=True)

    # Weighted sum of encoder states over S as a batched matmul on the MXU.
    ctx = jnp.einsum(
        "bqs,bsh->bqh",
        attn.reshape(tb, 1, s).astype(enc.dtype), enc,
        preferred_element_type=jnp.float32)                           # (TB, 1, H)
    out_ref[...] = ctx.astype(out_ref.dtype)


def bahdanau_attention(encoder_hidden_states, decoder_hidden_state, w1, b1, w2,
                       *, input_dtype=None, batch_block=None):
    """encoder_hidden_states: (B, S, H_enc); decoder_hidden_state: (L, B, H_dec).

    w1: (concat_dim, latent_dim) with concat order [decoder_flat, encoder],
    b1: (latent_dim,), w2: (latent_dim,).  Returns context: (B, 1, H_enc) f32.

    input_dtype: optionally cast encoder states / W1_enc (e.g. jnp.bfloat16) to
    halve HBM traffic; accumulation and softmax stay f32.
    """
    B, S, H_enc = encoder_hidden_states.shape
    L, B2, H_dec = decoder_hidden_state.shape
    assert B == B2
    concat_dim, latent_dim = w1.shape
    dec_dim = L * H_dec
    assert concat_dim == dec_dim + H_enc

    # Algebraic split of linear_1: decoder part computed once per batch element
    # in plain JAX (tiny); the broadcast concat tensor is never built.
    w1_dec = w1[:dec_dim]                              # (L*H_dec, latent)
    w1_enc = w1[dec_dim:]                              # (H_enc,   latent)
    dec_flat = jnp.transpose(decoder_hidden_state, (1, 0, 2)).reshape(B, dec_dim)
    dec_proj = (dec_flat @ w1_dec + b1).astype(jnp.float32).reshape(B, 1, latent_dim)
    w2_row = w2.reshape(1, 1, latent_dim).astype(jnp.float32)

    enc_in = encoder_hidden_states
    if input_dtype is not None:
        enc_in = enc_in.astype(input_dtype)
        w1_enc = w1_enc.astype(input_dtype)

    # Several batch elements per grid step to amortize per-step overhead.
    if batch_block is None:
        batch_block = next(tb for tb in (16, 8, 4, 2, 1) if B % tb == 0)
    TB = batch_block
    assert B % TB == 0

    grid_spec = pltpu.PrefetchScalarGridSpec(
        num_scalar_prefetch=0,
        grid=(B // TB,),
        in_specs=[
            pl.BlockSpec((TB, S, H_enc), lambda b: (b, 0, 0)),
            pl.BlockSpec((TB, 1, latent_dim), lambda b: (b, 0, 0)),
            pl.BlockSpec((H_enc, latent_dim), lambda b: (0, 0)),
            pl.BlockSpec((1, 1, latent_dim), lambda b: (0, 0, 0)),
        ],
        out_specs=pl.BlockSpec((TB, 1, H_enc), lambda b: (b, 0, 0)),
    )

    return pl.pallas_call(
        _attn_kernel,
        out_shape=jax.ShapeDtypeStruct((B, 1, H_enc), jnp.float32),
        grid_spec=grid_spec,
        compiler_params=pltpu.CompilerParams(dimension_semantics=("parallel",)),
    )(enc_in, dec_proj, w1_enc, w2_row)


def _reference(encoder_hidden_states, decoder_hidden_state, w1, b1, w2):
    B, S, H_enc = encoder_hidden_states.shape
    L, _, H_dec = decoder_hidden_state.shape
    dec_flat = jnp.transpose(decoder_hidden_state, (1, 0, 2)).reshape(B, L * H_dec)
    dec_tiled = jnp.broadcast_to(dec_flat[:, None, :], (B, S, L * H_dec))
    attn_input = jnp.concatenate([dec_tiled, encoder_hidden_states], axis=2)
    h = jnp.tanh(attn_input @ w1 + b1)
    logits = h @ w2.reshape(-1, 1)
    attn = jax.nn.softmax(logits, axis=1)
    return jnp.sum(encoder_hidden_states * attn, axis=1, keepdims=True)


if __name__ == "__main__":
    # Small, module-consistent shapes.
    B, S, H_enc = 2, 8, 32      # encoder: batch, seq, hidden
    L, H_dec = 2, 16            # decoder hidden: num_layers, hidden
    concat_dim = L * H_dec + H_enc   # 64
    latent_dim = 32

    key = jax.random.PRNGKey(0)
    k_enc, k_dec, k_w1, k_b1, k_w2 = jax.random.split(key, 5)

    encoder_hidden_states = jax.random.normal(k_enc, (B, S, H_enc), jnp.float32)
    decoder_hidden_state = jax.random.normal(k_dec, (L, B, H_dec), jnp.float32)

    # PyTorch Linear: y = x @ W^T + b; W kept pre-transposed as (in, out).
    w1 = jax.random.normal(k_w1, (concat_dim, latent_dim), jnp.float32) * 0.1
    b1 = jax.random.normal(k_b1, (latent_dim,), jnp.float32) * 0.1
    w2 = jax.random.normal(k_w2, (latent_dim,), jnp.float32) * 0.1

    ref = _reference(encoder_hidden_states, decoder_hidden_state, w1, b1, w2)

    # Full-precision path (approx reciprocal on the EUP -> ~1e-4 rel. error).
    out = bahdanau_attention(encoder_hidden_states, decoder_hidden_state, w1, b1, w2)
    out = jax.block_until_ready(out)
    assert out.shape == (B, 1, H_enc)
    assert jnp.allclose(out, ref, atol=2e-3, rtol=2e-3)

    # bf16-input path: halves HBM traffic for encoder states / W1_enc.
    out_bf16 = bahdanau_attention(
        encoder_hidden_states, decoder_hidden_state, w1, b1, w2,
        input_dtype=jnp.bfloat16)
    out_bf16 = jax.block_until_ready(out_bf16)
    assert out_bf16.shape == (B, 1, H_enc)
    assert jnp.allclose(out_bf16, ref, atol=5e-2, rtol=5e-2)

    print("KERNEL_OK")
</pallas_src>

<mosaic_0001>
module attributes {stable_mosaic.version = 11 : i64} {
  func.func @_attn_kernel(%arg0: i32, %arg1: memref<2x8x32xf32, #tpu.memory_space<vmem>>, %arg2: memref<2x1x32xf32, #tpu.memory_space<vmem>>, %arg3: memref<32x32xf32, #tpu.memory_space<vmem>>, %arg4: memref<1x1x32xf32, #tpu.memory_space<vmem>>, %arg5: memref<2x1x32xf32, #tpu.memory_space<vmem>>) attributes {dimension_semantics = [#tpu.dimension_semantics<parallel>], iteration_bounds = array<i64: 1>, scalar_prefetch = 0 : i64, scratch_operands = 0 : i64, tpu.core_type = #tpu.core_type<tc>, window_params = [{transform_indices = @transform_0, window_bounds = array<i64: 2, 8, 32>}, {transform_indices = @transform_1, window_bounds = array<i64: 2, 1, 32>}, {pipeline_mode = #tpu.pipeline_mode<synchronous>, transform_indices = @transform_2, window_bounds = array<i64: 32, 32>}, {pipeline_mode = #tpu.pipeline_mode<synchronous>, transform_indices = @transform_3, window_bounds = array<i64: 1, 1, 32>}, {transform_indices = @transform_4, window_bounds = array<i64: 2, 1, 32>}]} {
    %c0 = arith.constant 0 : index
    %c0_0 = arith.constant 0 : index
    %c0_1 = arith.constant 0 : index
    %0 = vector.load %arg1[%c0, %c0_0, %c0_1] : memref<2x8x32xf32, #tpu.memory_space<vmem>>, vector<2x8x32xf32>
    %1 = vector.shape_cast %0 : vector<2x8x32xf32> to vector<16x32xf32>
    %c0_2 = arith.constant 0 : index
    %c0_3 = arith.constant 0 : index
    %2 = vector.load %arg3[%c0_2, %c0_3] : memref<32x32xf32, #tpu.memory_space<vmem>>, vector<32x32xf32>
    %cst = arith.constant dense<0.000000e+00> : vector<16x32xf32>
    %3 = tpu.matmul %1, %2, %cst {dimension_numbers = #tpu.dot_dimension_numbers<[1], [0], [0], [1], [0, 0, 1, 1], [], []>} : vector<16x32xf32>, vector<32x32xf32>, vector<16x32xf32> -> vector<16x32xf32>
    %4 = vector.shape_cast %3 : vector<16x32xf32> to vector<2x8x32xf32>
    %c0_4 = arith.constant 0 : index
    %c0_5 = arith.constant 0 : index
    %c0_6 = arith.constant 0 : index
    %5 = vector.load %arg2[%c0_4, %c0_5, %c0_6] : memref<2x1x32xf32, #tpu.memory_space<vmem>>, vector<2x1x32xf32>
    %6 = vector.broadcast %5 : vector<2x1x32xf32> to vector<2x8x32xf32>
    %7 = arith.addf %4, %6 : vector<2x8x32xf32>
    %8 = math.tanh %7 : vector<2x8x32xf32>
    %c0_7 = arith.constant 0 : index
    %c0_8 = arith.constant 0 : index
    %c0_9 = arith.constant 0 : index
    %9 = vector.load %arg4[%c0_7, %c0_8, %c0_9] : memref<1x1x32xf32, #tpu.memory_space<vmem>>, vector<1x1x32xf32>
    %10 = vector.broadcast %9 : vector<1x1x32xf32> to vector<2x8x32xf32>
    %11 = arith.mulf %8, %10 : vector<2x8x32xf32>
    %cst_10 = arith.constant dense<0.000000e+00> : vector<2x8xf32>
    %12 = vector.multi_reduction <add>, %11, %cst_10 [2] : vector<2x8x32xf32> to vector<2x8xf32>
    %cst_11 = arith.constant dense<0xFF800000> : vector<2xf32>
    %13 = vector.multi_reduction <maximumf>, %12, %cst_11 [1] : vector<2x8xf32> to vector<2xf32>
    %14 = vector.shape_cast %13 : vector<2xf32> to vector<2x1xf32>
    %15 = vector.broadcast %14 : vector<2x1xf32> to vector<2x8xf32>
    %16 = arith.subf %12, %15 : vector<2x8xf32>
    %17 = math.exp %16 : vector<2x8xf32>
    %cst_12 = arith.constant dense<0.000000e+00> : vector<2xf32>
    %18 = vector.multi_reduction <add>, %17, %cst_12 [1] : vector<2x8xf32> to vector<2xf32>
    %19 = vector.shape_cast %18 : vector<2xf32> to vector<2x1xf32>
    %20 = tpu.reciprocal %19 {approx = true} : vector<2x1xf32> -> vector<2x1xf32>
    %21 = vector.broadcast %20 : vector<2x1xf32> to vector<2x8xf32>
    %22 = arith.mulf %17, %21 : vector<2x8xf32>
    %23 = vector.shape_cast %22 : vector<2x8xf32> to vector<2x1x8xf32>
    "tpu.trace_start"() <{level = 10 : i32, message = "bqs,bsh->bqh"}> : () -> ()
    %cst_13 = arith.constant dense<0.000000e+00> : vector<2x1x32xf32>
    %24 = tpu.matmul %23, %0, %cst_13 {dimension_numbers = #tpu.dot_dimension_numbers<[2], [1], [1], [2], [0, 0, 0, 1, 1, 2], [0], [0]>} : vector<2x1x8xf32>, vector<2x8x32xf32>, vector<2x1x32xf32> -> vector<2x1x32xf32>
    "tpu.trace_stop"() : () -> ()
    %c0_14 = arith.constant 0 : index
    %c0_15 = arith.constant 0 : index
    %c0_16 = arith.constant 0 : index
    %25 = vector.load %arg5[%c0_14, %c0_15, %c0_16] : memref<2x1x32xf32, #tpu.memory_space<vmem>>, vector<2x1x32xf32>
    tpu.vector_store %arg5[%c0_14, %c0_15, %c0_16], %24 {strides = array<i32>} : memref<2x1x32xf32, #tpu.memory_space<vmem>>, vector<2x1x32xf32>,
    return
  }
  func.func @transform_0(%arg0: i32) -> (i32, i32, i32) {
    %c0_i32 = arith.constant 0 : i32
    %c0_i32_0 = arith.constant 0 : i32
    %c0_i32_1 = arith.constant 0 : i32
    return %arg0, %c0_i32, %c0_i32_0 : i32, i32, i32
  }
  func.func @transform_1(%arg0: i32) -> (i32, i32, i32) {
    %c0_i32 = arith.constant 0 : i32
    %c0_i32_0 = arith.constant 0 : i32
    %c0_i32_1 = arith.constant 0 : i32
    return %arg0, %c0_i32, %c0_i32_0 : i32, i32, i32
  }
  func.func @transform_2(%arg0: i32) -> (i32, i32) {
    %c0_i32 = arith.constant 0 : i32
    %c0_i32_0 = arith.constant 0 : i32
    %c0_i32_1 = arith.constant 0 : i32
    return %c0_i32, %c0_i32_0 : i32, i32
  }
  func.func @transform_3(%arg0: i32) -> (i32, i32, i32) {
    %c0_i32 = arith.constant 0 : i32
    %c0_i32_0 = arith.constant 0 : i32
    %c0_i32_1 = arith.constant 0 : i32
    %c0_i32_2 = arith.constant 0 : i32
    return %c0_i32, %c0_i32_0, %c0_i32_1 : i32, i32, i32
  }
  func.func @transform_4(%arg0: i32) -> (i32, i32, i32) {
    %c0_i32 = arith.constant 0 : i32
    %c0_i32_0 = arith.constant 0 : i32
    %c0_i32_1 = arith.constant 0 : i32
    return %arg0, %c0_i32, %c0_i32_0 : i32, i32, i32
  }
}

</mosaic_0001>

<bundles_post_ra>
// kernel: tpu_custom_call.1
= control target key start
LH: loop header
LB: loop body
LE: loop exit
PB: predicated region body
PF: predicated region fallthrough
CT: control target
= control target key end

     0   :  { %9 = vsyncpa [#allocation3], 0  ;;  %s653_s0 = inlined_call_operand.hbm [shape: f32[2,8,32], index: 0, kind: input, shape index: {}]   ;;  %s654_s1 = inlined_call_operand.hbm [shape: f32[2,1,32], index: 1, kind: input, shape index: {}]   ;;  %s655_s2 = inlined_call_operand.hbm [shape: f32[32,32], index: 2, kind: input, shape index: {}]   ;;  %s656_s3 = inlined_call_operand.vmem [shape: f32[1,1,32], index: 3, kind: input, shape index: {}]   ;;  %s657_s4 = inlined_call_operand.hbm [shape: f32[2,1,32], index: 4, kind: output, shape index: {}]  }
   0x1   :  { %10 = vsyncpa [#allocation6], 0 }
   0x2   :  { %11 = vsyncpa [#allocation4], 0  ;;  %s580_s15 = smov [#allocation5]  }
   0x3   :  { %s29_s16 = sshll.u32 %s580_s15, 4  ;;  %s30_s16 = int_to_ptr.vmem [resolvable:$true] %s29_s16 }
   0x4   :  { %s502_s17 = scalar_lea.vmem %s30_s16, 32  ;;  %p507_p1 = scmp.lt.s32.totalorder %s30_s16, %s30_s16 }
   0x5   :  { %p503_p0 = scmp.ne.s32.totalorder %s30_s16, %s502_s17  ;;  %p508_p2 = scmp.lt.s32.totalorder %s502_s17, %s502_s17 }
   0x7   :  { %p509_p3 = por %p508_p2, %p507_p1 }
   0x9   :  { %p510_p4 = pnand %p509_p3, %p503_p0 }
   0xb   :  { %513 = shalt.err (!%p510_p4)
}
   0xc   :  { %s581_s18 = smov 16   ;;  %s582_s19 = smov 1  }
   0xd   :  { %35 = dma.hbm_to_vmem [thread:$0]  %s654_s1, 32, %s30_s16, [#allocation6], %s581_s18, %s581_s18, %s582_s19  }
   0xe   :  { %s583_s22 = smov [#allocation2]  }
   0xf   :  { %s17_s23 = sshll.u32 %s583_s22, 4  ;;  %s18_s23 = int_to_ptr.vmem [resolvable:$true] %s17_s23 }
  0x10   :  { %s522_s24 = scalar_lea.vmem %s18_s23, 256  ;;  %p527_p6 = scmp.lt.s32.totalorder %s18_s23, %s18_s23 }
  0x11   :  { %p523_p5 = scmp.ne.s32.totalorder %s18_s23, %s522_s24  ;;  %p528_p7 = scmp.lt.s32.totalorder %s522_s24, %s522_s24 }
  0x13   :  { %p529_p8 = por %p528_p7, %p527_p6 }
  0x15   :  { %p530_p9 = pnand %p529_p8, %p523_p5 }
  0x17   :  { %533 = shalt.err (!%p530_p9)
}
  0x18   :  { %s584_s25 = smov 128   ;;  %s585_s26 = smov 8  }
  0x19   :  { %23 = dma.hbm_to_vmem [thread:$0]  %s653_s0, 256, %s18_s23, [#allocation3], %s584_s25, %s584_s25, %s585_s26  }
  0x1a   :  { %s586_s29 = smov [#allocation7]  }
  0x1b   :  { %s41_s30 = sshll.u32 %s586_s29, 4  ;;  %s42_s30 = int_to_ptr.vmem [resolvable:$true] %s41_s30 }
  0x1c   :  { %s542_s1 = scalar_lea.vmem %s42_s30, 512  ;;  %p547_p11 = scmp.lt.s32.totalorder %s42_s30, %s42_s30 }
  0x1d   :  { %p543_p10 = scmp.ne.s32.totalorder %s42_s30, %s542_s1  ;;  %p548_p12 = scmp.lt.s32.totalorder %s542_s1, %s542_s1 }
  0x1f   :  { %p549_p13 = por %p548_p12, %p547_p11 }
  0x21   :  { %p550_p0 = pnand %p549_p13, %p543_p10 }
  0x23   :  { %553 = shalt.err (!%p550_p0)
}
  0x24   :  { %47 = dma.hbm_to_vmem [thread:$0]  %s655_s2, 512, %s42_s30, [#allocation6], %s584_s25, %s584_s25, %s585_s26  }
  0x25   :  { %574 = dma.done.wait [#allocation3], 256  }
  0x26   :  { %575 = vsyncadd [#allocation3], 4294967040 }
  0x27   :  { %576 = dma.done.wait [#allocation6], 544  }
  0x28   :  { %577 = vsyncadd [#allocation6], 4294966752  ;;  %vm65_vm0 = vcmask 261120   ;;  %v64_v0 = vld [vmem:[#allocation7 + $0x18] sm:$0xff]  ;;  %v63_v1 = vld [vmem:[#allocation7 + $0x10] sm:$0xff]  ;;  %v182_v19 = vlaneseq  ;;  %vm192_vm1 = vcmask 1041409  }
  0x29   :  { %450 = vmatprep.subr.mxu0 %v64_v0  ;;  %v628_v2 = vld [vmem:[#allocation2] sm:$0xff]  ;;  %v61_v4 = vld [vmem:[#allocation7] sm:$0xff]  ;;  %v632_v5 = vld [vmem:[#allocation2 + $0x8] sm:$0xff]  ;;  %vm195_vm2 = vcmask 58368   ;;  %v587_v29 = vmov 0   ;;  %v588_v47 = vmov 0.0  }
  0x2a   :  { %451 = vmatpush3.msra.mxu0 %v64_v0  ;;  %v62_v3 = vld [vmem:[#allocation7 + $0x8] sm:$0xff]  ;;  %458 = vmatprep.mubr.msk.f32.mxu0 %vm65_vm0, %v628_v2  ;;  %v436_v6 = vld [vmem:[#allocation5 + $0x1] ss:$0 sm:$0xff]  ;;  %v435_v8 = vld [vmem:[#allocation5] ss:$0 sm:$0xff]  ;;  %v183_v20 = vand.u32 127, %v182_v19 }
  0x2b   :  { %452 = vmatprep.subr.mxu0 %v63_v1  ;;  %v437_v14 = vld [vmem:[%s656_s3] ss:$0 sm:$0xff]  ;;  %v185_v21 = vshrl.u32 %v182_v19, 7  ;;  %483 = vset.pattern.permute.xlu0 %v587_v29  ;;  %vm589_vm3 = vmmov 0   ;;  %vm259_vm4 = vcmask 64512   ;;  %vm412_vm5 = vcmask 253952  }
  0x2c   :  { %453 = vmatpush3.msra.mxu0 %v63_v1  ;;  %482 = vset.pattern.permute.xlu1 %v587_v29  ;;  %s590_s3 = smov [#allocation8]  }
  0x2d   :  { %454 = vmatprep.subr.mxu0 %v62_v3  ;;  %v186_v23 = vsub.s32 %v183_v20, %v185_v21  ;;  %v202_v30 = vsub.s32 0, %v185_v21  ;;  %v206_v31 = vsub.s32 1, %v185_v21  ;;  %461 = vmatprep.subr.mxu1 %v588_v47  ;;  %s420_s7 = sshll.u32 %s590_s3, 4  ;;  %s421_s7 = int_to_ptr.vmem [resolvable:$true] %s420_s7 }
  0x2e   :  { %455 = vmatpush3.msra.mxu0 %v62_v3  ;;  %462 = vmatpush3.msra.mxu1 %v628_v2  ;;  %s554_s8 = scalar_lea.vmem %s421_s7, 32  ;;  %p559_p2 = scmp.lt.s32.totalorder %s421_s7, %s421_s7 }
  0x2f   :  { %456 = vmatprep.subr.mxu0 %v61_v4  ;;  %466 = vmatprep.subr.mxu1 %v588_v47  ;;  %p555_p1 = scmp.ne.s32.totalorder %s421_s7, %s554_s8  ;;  %p560_p3 = scmp.lt.s32.totalorder %s554_s8, %s554_s8 }
  0x30   :  { %457 = vmatpush3.msra.mxu0 %v61_v4  ;;  %463 = vmatprep.mubr.msk.f32.mxu1 %vm589_vm3, %v588_v47 }
  0x31   :  { %459 = vmatmul.mubr.msk.f32.vlgmr.msra.gmra.mxu0 %vm65_vm0, %v632_v5  ;;  %p561_p4 = por %p560_p3, %p559_p2 }
  0x33   :  { %p562_p5 = pnand %p561_p4, %p555_p1 }
  0xf1   :  { %v460_v7 = vpop.f32.mrf.mxu0 }
  0xf2   :  { %v162_v9 = vadd.f32 %v460_v7, %v436_v6 }
  0xf3   :  { %v138_v10 = vpop.f32.mrf.mxu0 }
  0xf4   :  { %v161_v11 = vadd.f32 %v435_v8, %v138_v10  ;;  %484 = vtanh.f32 %v162_v9 }
  0xf6   :  { %486 = vtanh.f32 %v161_v11 }
 0x101   :  { %v485_v12 = vpop.eup %484 }
 0x102   :  { %v173_v17 = vmul.f32 %v485_v12, %v437_v14 }
 0x103   :  { %v487_v13 = vpop.eup %486 }
 0x104   :  { %v172_v15 = vmul.f32 %v487_v13, %v437_v14  ;;  %v177_v18 = vsel %vm65_vm0, %v173_v17, 0.0 }
 0x106   :  { %v174_v16 = vsel %vm65_vm0, %v172_v15, 0.0 }
 0x107   :  { %175 = vadd.xlane.f32.xlu0 %v174_v16 }
 0x10b   :  { %178 = vadd.xlane.f32.xlu0 %v177_v18 }
 0x190   :  { %v176_v22 = vpop.xlane.xlu0 %175 }
 0x191   :  { %v187_v25 = vrot.slane %v176_v22, %v186_v23 }
 0x194   :  { %v179_v24 = vpop.xlane.xlu0 %178 }
 0x195   :  { %v191_v26 = vrot.slane %v179_v24, %v186_v23 }
 0x197   :  { %v193_v27 = vsel %vm192_vm1, %v191_v26, %v187_v25 }
 0x198   :  { %v196_v28 = vsel %vm195_vm2, %v193_v27, -inf }
 0x199   :  { %197 = vmax.xlane.f32.xlu1 %v196_v28 }
 0x222   :  { %v198_v32 = vpop.xlane.xlu1 %197 }
 0x223   :  { %v203_v33 = vrot.slane %v198_v32, %v202_v30  ;;  %v207_v34 = vrot.slane %v198_v32, %v206_v31 }
 0x225   :  { %v210_v35 = vsub.f32 %v176_v22, %v203_v33  ;;  %v211_v36 = vsub.f32 %v179_v24, %v207_v34 }
 0x227   :  { %v212_v37 = vmul.f32 1.442695, %v210_v35  ;;  %v214_v38 = vmul.f32 1.442695, %v211_v36 }
 0x229   :  { %488 = vpow2.f32 %v212_v37 }
 0x22a   :  { %490 = vpow2.f32 %v214_v38 }
 0x236   :  { %v489_v39 = vpop.eup %488 }
 0x237   :  { %v491_v40 = vpop.eup %490  ;;  %219 = vperm.xlu1 %482, %v489_v39  }
 0x238   :  { %222 = vperm.xlu0 %483, %v491_v40  }
 0x2b2   :  { %v220_v41 = vpop.permute.xlu1 %219 }
 0x2b3   :  { %v223_v42 = vpop.permute.xlu0 %222  ;;  %v227_v43 = vrot.slane %v220_v41, %v186_v23 }
 0x2b4   :  { %v231_v44 = vrot.slane %v223_v42, %v186_v23 }
 0x2b6   :  { %v232_v45 = vsel %vm192_vm1, %v231_v44, %v227_v43 }
 0x2b7   :  { %v234_v46 = vsel %vm195_vm2, %v232_v45, 0.0 }
 0x2b8   :  { %235 = vadd.xlane.f32.xlu1 %v234_v46 }
 0x341   :  { %v236_v48 = vpop.xlane.xlu1 %235 }
 0x342   :  { %492 = vrcp.f32 %v236_v48 }
 0x34f   :  { %v493_v49 = vpop.eup %492 }
 0x350   :  { %v242_v50 = vrot.slane %v493_v49, %v202_v30  ;;  %v246_v52 = vrot.slane %v493_v49, %v206_v31 }
 0x352   :  { %v249_v51 = vmul.f32 %v489_v39, %v242_v50  ;;  %v250_v53 = vmul.f32 %v491_v40, %v246_v52 }
 0x354   :  { %253 = vperm.xlu0 %483, %v249_v51  }
 0x358   :  { %334 = vperm.xlu0 %483, %v250_v53  }
 0x3cf   :  { %v254_v54 = vpop.permute.xlu0 %253 }
 0x3d0   :  { %v258_v55 = vrot.slane %v254_v54, %v186_v23 }
 0x3d2   :  { %464 = vmatmul.mubr.msk.f32.vlgmr.msra.gmra.mxu1 %vm259_vm4, %v258_v55 }
 0x3d3   :  { %467 = vmatpush3.msra.mxu1 %v632_v5  ;;  %v335_v56 = vpop.permute.xlu0 %334  ;;  %468 = vmatprep.mubr.msk.f32.mxu1 %vm589_vm3, %v588_v47 }
 0x3d4   :  { %v339_v57 = vrot.slane %v335_v56, %v186_v23 }
 0x3d6   :  { %469 = vmatmul.mubr.msk.f32.vlgmr.msra.gmra.mxu1 %vm259_vm4, %v339_v57 }
 0x492   :  { %v328_v58 = vpop.f32.mrf.mxu1 }
 0x493   :  { %413 = vst.msk [vmem:[#allocation8] sm:$0x1] %vm412_vm5, %v328_v58 }
 0x494   :  { %v465_v59 = vpop.f32.mrf.mxu1 }
 0x496   :  { %v408_v60 = vpop.f32.mrf.mxu1 }
 0x497   :  { %414 = vst.msk [vmem:[#allocation8 + $0x1] sm:$0x1] %vm412_vm5, %v408_v60 }
 0x498   :  { %v470_v61 = vpop.f32.mrf.mxu1 }
 0x499   :  { %565 = shalt.err (!%p562_p5)
}
 0x49a   :  { %426 = dma.vmem_to_hbm [thread:$0]  %s421_s7, 32, %s657_s4, [#allocation4], %s581_s18, %s581_s18, %s582_s19  }
 0x49b   :  { %578 = dma.done.wait [#allocation4], 32  }
 0x49c   :  { %579 = vsyncadd [#allocation4], 4294967264 }
 0x49d   :  { %430 = vsyncpa [#allocation3], 1 }
 0x49e   :  { %431 = vsyncpa [#allocation6], 1 }
 0x49f   :  { %432 = vsyncpa [#allocation4], 1 }

</bundles_post_ra>
